<compile_context>
chip_gen: v6e
topology: v6e:2x2x1
jax: 0.10.0
libtpu: 0.0.40
codegen_flags: <defaults>
</compile_context>

<pallas_src>
import jax
import jax.numpy as jnp
from jax.experimental import pallas as pl
from jax.experimental.pallas import tpu as pltpu


def simple_model_kernel(x_ref, w1_ref, b1_ref, w2_ref, b2_ref, w3_ref, b3_ref,
                        out_ref, *, process_param_l):
    neg_inv_l = -1.0 / process_param_l
    hp = jax.lax.Precision.HIGHEST

    # x_ref block: (3, TB) -- features on sublanes, batch on lanes.
    y = jnp.exp(x_ref[...] * neg_inv_l)        # one EUP pass covers all 3 rows
    y1 = y[0:1, :]                             # (1, TB) sublane slices (cheap)
    y2 = y[1:2, :]
    y3 = y[2:3, :]

    p1 = y2 + y3
    p2 = jnp.sqrt(y2 * y2 + y3 * y3)
    p3 = y1

    # Layer 1 (in=3, scaler already folded into w1/b1): three rank-1 FMAs.
    w1 = w1_ref[...]                           # (neuron, 3)
    h = w1[:, 0:1] * p1 + w1[:, 1:2] * p2 + w1[:, 2:3] * p3 + b1_ref[...]
    h = jnp.maximum(h, 0.0)                    # (neuron, TB)

    # Layer 2: (neuron, neuron) @ (neuron, TB) on the MXU.
    h = jnp.dot(w2_ref[...], h,
                preferred_element_type=jnp.float32, precision=hp) + b2_ref[...]
    h = jnp.maximum(h, 0.0)

    # Layer 3: (1, neuron) @ (neuron, TB) -> lane-dense (1, TB) output.
    out = jnp.dot(w3_ref[...], h,
                  preferred_element_type=jnp.float32, precision=hp) + b3_ref[...]
    out_ref[...] = out.astype(out_ref.dtype)


def simple_model_forward(x, params, process_param_l=0.5, block_b=512):
    """x: (batch, 3) float32 (PyTorch layout). Returns (batch, 1) float32."""
    if x.ndim == 1:
        x = x[None, :]
    B = x.shape[0]
    smin, sscale, w1, b1, w2, b2, w3, b3 = params   # PyTorch (out, in) layouts

    # Fold the MinMaxScaler affine into fc1.
    w1f = (w1 / sscale[None, :]).astype(jnp.float32)          # (neuron, 3)
    b1f = (b1 - w1f @ smin).astype(jnp.float32)               # (neuron,)
    neuron = w1.shape[0]

    # Transpose so batch sits on the lane axis; pad batch to a tile multiple
    # (VMEM refs have no bounds checks -> never hand the kernel a ragged tile).
    xT = x.T.astype(jnp.float32)                              # (3, B)
    pad = (-B) % block_b
    Bp = B + pad
    if pad:
        xT = jnp.pad(xT, ((0, 0), (0, pad)))

    kernel = lambda *refs: simple_model_kernel(
        *refs, process_param_l=process_param_l)

    const = lambda i: (0, 0)      # params: fetched once, resident across steps

    out_t = pl.pallas_call(
        kernel,
        out_shape=jax.ShapeDtypeStruct((1, Bp), jnp.float32),
        grid_spec=pltpu.PrefetchScalarGridSpec(
            num_scalar_prefetch=0,
            grid=(Bp // block_b,),
            in_specs=[
                pl.BlockSpec((3, block_b), lambda i: (0, i)),     # x tile
                pl.BlockSpec((neuron, 3), const),                 # w1 (folded)
                pl.BlockSpec((neuron, 1), const),                 # b1 (folded)
                pl.BlockSpec((neuron, neuron), const),            # w2
                pl.BlockSpec((neuron, 1), const),                 # b2
                pl.BlockSpec((1, neuron), const),                 # w3
                pl.BlockSpec((1, 1), const),                      # b3
            ],
            out_specs=pl.BlockSpec((1, block_b), lambda i: (0, i)),
        ),
        compiler_params=pltpu.CompilerParams(
            dimension_semantics=("parallel",)),
    )(xT, w1f, b1f.reshape(neuron, 1), w2, b2.reshape(neuron, 1),
      w3, b3.reshape(1, 1))

    return out_t[:, :B].T         # (B, 1), matching the PyTorch module


def make_params(key, input_dim, neuron):
    """Deterministic synthetic parameters in native PyTorch layouts."""
    ks = jax.random.split(key, 8)
    scaler_min = jax.random.uniform(ks[0], (input_dim,), jnp.float32, 0.0, 0.5)
    scaler_scale = jax.random.uniform(ks[1], (input_dim,), jnp.float32, 0.5, 1.5)
    w1 = jax.random.normal(ks[2], (neuron, input_dim), jnp.float32) * 0.3
    b1 = jax.random.normal(ks[3], (neuron,), jnp.float32) * 0.1
    w2 = jax.random.normal(ks[4], (neuron, neuron), jnp.float32) * 0.3
    b2 = jax.random.normal(ks[5], (neuron,), jnp.float32) * 0.1
    w3 = jax.random.normal(ks[6], (1, neuron), jnp.float32) * 0.3
    b3 = jax.random.normal(ks[7], (1,), jnp.float32) * 0.1
    return (scaler_min, scaler_scale, w1, b1, w2, b2, w3, b3)


def reference_forward(x, params, process_param_l=0.5):
    """Pure-JAX reference mirroring the PyTorch forward exactly."""
    smin, sscale, w1, b1, w2, b2, w3, b3 = params
    hp = jax.lax.Precision.HIGHEST
    r1, r2, r3 = x[:, 0], x[:, 1], x[:, 2]
    y1 = jnp.exp(-r1 / process_param_l)
    y2 = jnp.exp(-r2 / process_param_l)
    y3 = jnp.exp(-r3 / process_param_l)
    processed = jnp.stack((y2 + y3, jnp.sqrt(y2 ** 2 + y3 ** 2), y1), axis=1)
    scaled = (processed - smin) / sscale
    h = jax.nn.relu(jnp.dot(scaled, w1.T, precision=hp) + b1)
    h = jax.nn.relu(jnp.dot(h, w2.T, precision=hp) + b2)
    return jnp.dot(h, w3.T, precision=hp) + b3


if __name__ == "__main__":
    input_dim = 3      # fixed by the forward pass (uses x[:, 0..2])
    neuron = 32
    batch = 200        # not a tile multiple -> exercises padding + 2 grid steps
    process_param_l = 0.5

    key = jax.random.PRNGKey(0)
    kx, kp = jax.random.split(key)
    x = jax.random.uniform(kx, (batch, input_dim), jnp.float32, 0.1, 2.0)
    params = make_params(kp, input_dim, neuron)

    out = simple_model_forward(x, params, process_param_l, block_b=128)
    out = jax.block_until_ready(out)

    ref = reference_forward(x, params, process_param_l)
    assert out.shape == (batch, 1)
    assert jnp.allclose(out, ref, atol=1e-5, rtol=1e-5), \
        float(jnp.max(jnp.abs(out - ref)))

    print("KERNEL_OK")
</pallas_src>

<mosaic_0001>
module attributes {stable_mosaic.version = 11 : i64} {
  func.func @_lambda_(%arg0: i32, %arg1: memref<3x128xf32, #tpu.memory_space<vmem>>, %arg2: memref<32x3xf32, #tpu.memory_space<vmem>>, %arg3: memref<32x1xf32, #tpu.memory_space<vmem>>, %arg4: memref<32x32xf32, #tpu.memory_space<vmem>>, %arg5: memref<32x1xf32, #tpu.memory_space<vmem>>, %arg6: memref<1x32xf32, #tpu.memory_space<vmem>>, %arg7: memref<1x1xf32, #tpu.memory_space<vmem>>, %arg8: memref<1x128xf32, #tpu.memory_space<vmem>>) attributes {dimension_semantics = [#tpu.dimension_semantics<parallel>], iteration_bounds = array<i64: 2>, scalar_prefetch = 0 : i64, scratch_operands = 0 : i64, tpu.core_type = #tpu.core_type<tc>, window_params = [{transform_indices = @transform_0, window_bounds = array<i64: 3, 128>}, {pipeline_mode = #tpu.pipeline_mode<synchronous>, transform_indices = @transform_1, window_bounds = array<i64: 32, 3>}, {pipeline_mode = #tpu.pipeline_mode<synchronous>, transform_indices = @transform_2, window_bounds = array<i64: 32, 1>}, {pipeline_mode = #tpu.pipeline_mode<synchronous>, transform_indices = @transform_3, window_bounds = array<i64: 32, 32>}, {pipeline_mode = #tpu.pipeline_mode<synchronous>, transform_indices = @transform_4, window_bounds = array<i64: 32, 1>}, {pipeline_mode = #tpu.pipeline_mode<synchronous>, transform_indices = @transform_5, window_bounds = array<i64: 1, 32>}, {pipeline_mode = #tpu.pipeline_mode<synchronous>, transform_indices = @transform_6, window_bounds = array<i64: 1, 1>}, {transform_indices = @transform_7, window_bounds = array<i64: 1, 128>}]} {
    %c0 = arith.constant 0 : index
    %c0_0 = arith.constant 0 : index
    %0 = vector.load %arg1[%c0, %c0_0] : memref<3x128xf32, #tpu.memory_space<vmem>>, vector<3x128xf32>
    %cst = arith.constant -2.000000e+00 : f32
    %1 = vector.broadcast %cst : f32 to vector<3x128xf32>
    %2 = arith.mulf %0, %1 : vector<3x128xf32>
    %3 = math.exp %2 : vector<3x128xf32>
    %4 = vector.extract_strided_slice %3 {offsets = [0, 0], sizes = [1, 128], strides = [1, 1]} : vector<3x128xf32> to vector<1x128xf32>
    %5 = vector.extract_strided_slice %3 {offsets = [1, 0], sizes = [1, 128], strides = [1, 1]} : vector<3x128xf32> to vector<1x128xf32>
    %6 = vector.extract_strided_slice %3 {offsets = [2, 0], sizes = [1, 128], strides = [1, 1]} : vector<3x128xf32> to vector<1x128xf32>
    %7 = arith.addf %5, %6 : vector<1x128xf32>
    %8 = arith.mulf %5, %5 : vector<1x128xf32>
    %9 = arith.mulf %6, %6 : vector<1x128xf32>
    %10 = arith.addf %8, %9 : vector<1x128xf32>
    %11 = math.sqrt %10 : vector<1x128xf32>
    %c0_1 = arith.constant 0 : index
    %c0_2 = arith.constant 0 : index
    %12 = vector.load %arg2[%c0_1, %c0_2] : memref<32x3xf32, #tpu.memory_space<vmem>>, vector<32x3xf32>
    %13 = vector.extract_strided_slice %12 {offsets = [0, 0], sizes = [32, 1], strides = [1, 1]} : vector<32x3xf32> to vector<32x1xf32>
    %14 = vector.broadcast %13 : vector<32x1xf32> to vector<32x128xf32>
    %15 = vector.broadcast %7 : vector<1x128xf32> to vector<32x128xf32>
    %16 = arith.mulf %14, %15 : vector<32x128xf32>
    %17 = vector.extract_strided_slice %12 {offsets = [0, 1], sizes = [32, 1], strides = [1, 1]} : vector<32x3xf32> to vector<32x1xf32>
    %18 = vector.broadcast %17 : vector<32x1xf32> to vector<32x128xf32>
    %19 = vector.broadcast %11 : vector<1x128xf32> to vector<32x128xf32>
    %20 = arith.mulf %18, %19 : vector<32x128xf32>
    %21 = arith.addf %16, %20 : vector<32x128xf32>
    %22 = vector.extract_strided_slice %12 {offsets = [0, 2], sizes = [32, 1], strides = [1, 1]} : vector<32x3xf32> to vector<32x1xf32>
    %23 = vector.broadcast %22 : vector<32x1xf32> to vector<32x128xf32>
    %24 = vector.broadcast %4 : vector<1x128xf32> to vector<32x128xf32>
    %25 = arith.mulf %23, %24 : vector<32x128xf32>
    %26 = arith.addf %21, %25 : vector<32x128xf32>
    %c0_3 = arith.constant 0 : index
    %c0_4 = arith.constant 0 : index
    %27 = vector.load %arg3[%c0_3, %c0_4] : memref<32x1xf32, #tpu.memory_space<vmem>>, vector<32x1xf32>
    %28 = vector.broadcast %27 : vector<32x1xf32> to vector<32x128xf32>
    %29 = arith.addf %26, %28 : vector<32x128xf32>
    %cst_5 = arith.constant 0.000000e+00 : f32
    %30 = vector.broadcast %cst_5 : f32 to vector<32x128xf32>
    %31 = arith.maximumf %29, %30 : vector<32x128xf32>
    %c0_6 = arith.constant 0 : index
    %c0_7 = arith.constant 0 : index
    %32 = vector.load %arg4[%c0_6, %c0_7] : memref<32x32xf32, #tpu.memory_space<vmem>>, vector<32x32xf32>
    %cst_8 = arith.constant dense<0.000000e+00> : vector<32x128xf32>
    %33 = tpu.matmul %32, %31, %cst_8 {dimension_numbers = #tpu.dot_dimension_numbers<[1], [0], [0], [1], [0, 0, 1, 1], [], []>, precision = #tpu.contract_precision<fp32>} : vector<32x32xf32>, vector<32x128xf32>, vector<32x128xf32> -> vector<32x128xf32>
    %c0_9 = arith.constant 0 : index
    %c0_10 = arith.constant 0 : index
    %34 = vector.load %arg5[%c0_9, %c0_10] : memref<32x1xf32, #tpu.memory_space<vmem>>, vector<32x1xf32>
    %35 = vector.broadcast %34 : vector<32x1xf32> to vector<32x128xf32>
    %36 = arith.addf %33, %35 : vector<32x128xf32>
    %cst_11 = arith.constant 0.000000e+00 : f32
    %37 = vector.broadcast %cst_11 : f32 to vector<32x128xf32>
    %38 = arith.maximumf %36, %37 : vector<32x128xf32>
    %c0_12 = arith.constant 0 : index
    %c0_13 = arith.constant 0 : index
    %39 = vector.load %arg6[%c0_12, %c0_13] : memref<1x32xf32, #tpu.memory_space<vmem>>, vector<1x32xf32>
    %cst_14 = arith.constant dense<0.000000e+00> : vector<1x128xf32>
    %40 = tpu.matmul %39, %38, %cst_14 {dimension_numbers = #tpu.dot_dimension_numbers<[1], [0], [0], [1], [0, 0, 1, 1], [], []>, precision = #tpu.contract_precision<fp32>} : vector<1x32xf32>, vector<32x128xf32>, vector<1x128xf32> -> vector<1x128xf32>
    %c0_15 = arith.constant 0 : index
    %c0_16 = arith.constant 0 : index
    %41 = vector.load %arg7[%c0_15, %c0_16] : memref<1x1xf32, #tpu.memory_space<vmem>>, vector<1x1xf32>
    %42 = vector.broadcast %41 : vector<1x1xf32> to vector<1x128xf32>
    %43 = arith.addf %40, %42 : vector<1x128xf32>
    %c0_17 = arith.constant 0 : index
    %c0_18 = arith.constant 0 : index
    %44 = vector.load %arg8[%c0_17, %c0_18] : memref<1x128xf32, #tpu.memory_space<vmem>>, vector<1x128xf32>
    tpu.vector_store %arg8[%c0_17, %c0_18], %43 {strides = array<i32>} : memref<1x128xf32, #tpu.memory_space<vmem>>, vector<1x128xf32>,
    return
  }
  func.func @transform_0(%arg0: i32) -> (i32, i32) {
    %c0_i32 = arith.constant 0 : i32
    %c0_i32_0 = arith.constant 0 : i32
    return %c0_i32, %arg0 : i32, i32
  }
  func.func @transform_1(%arg0: i32) -> (i32, i32) {
    %c0_i32 = arith.constant 0 : i32
    %c0_i32_0 = arith.constant 0 : i32
    %c0_i32_1 = arith.constant 0 : i32
    return %c0_i32, %c0_i32_0 : i32, i32
  }
  func.func @transform_2(%arg0: i32) -> (i32, i32) {
    %c0_i32 = arith.constant 0 : i32
    %c0_i32_0 = arith.constant 0 : i32
    %c0_i32_1 = arith.constant 0 : i32
    return %c0_i32, %c0_i32_0 : i32, i32
  }
  func.func @transform_3(%arg0: i32) -> (i32, i32) {
    %c0_i32 = arith.constant 0 : i32
    %c0_i32_0 = arith.constant 0 : i32
    %c0_i32_1 = arith.constant 0 : i32
    return %c0_i32, %c0_i32_0 : i32, i32
  }
  func.func @transform_4(%arg0: i32) -> (i32, i32) {
    %c0_i32 = arith.constant 0 : i32
    %c0_i32_0 = arith.constant 0 : i32
    %c0_i32_1 = arith.constant 0 : i32
    return %c0_i32, %c0_i32_0 : i32, i32
  }
  func.func @transform_5(%arg0: i32) -> (i32, i32) {
    %c0_i32 = arith.constant 0 : i32
    %c0_i32_0 = arith.constant 0 : i32
    %c0_i32_1 = arith.constant 0 : i32
    return %c0_i32, %c0_i32_0 : i32, i32
  }
  func.func @transform_6(%arg0: i32) -> (i32, i32) {
    %c0_i32 = arith.constant 0 : i32
    %c0_i32_0 = arith.constant 0 : i32
    %c0_i32_1 = arith.constant 0 : i32
    return %c0_i32, %c0_i32_0 : i32, i32
  }
  func.func @transform_7(%arg0: i32) -> (i32, i32) {
    %c0_i32 = arith.constant 0 : i32
    %c0_i32_0 = arith.constant 0 : i32
    return %c0_i32, %arg0 : i32, i32
  }
}

</mosaic_0001>

<bundles_post_ra>
// kernel: tpu_custom_call.1
= control target key start
LH: loop header
LB: loop body
LE: loop exit
PB: predicated region body
PF: predicated region fallthrough
CT: control target
= control target key end

     0   :  { %s2388_s0 = inlined_call_operand.vmem [shape: f32[3,256], index: 0, kind: input, shape index: {}]   ;;  %s2389_s1 = inlined_call_operand.vmem [shape: f32[32,3], index: 1, kind: input, shape index: {}]   ;;  %s2390_s2 = inlined_call_operand.vmem [shape: f32[32,1], index: 2, kind: input, shape index: {}]   ;;  %s2391_s3 = inlined_call_operand.vmem [shape: f32[32,32], index: 3, kind: input, shape index: {}]   ;;  %s2392_s4 = inlined_call_operand.vmem [shape: f32[32,1], index: 4, kind: input, shape index: {}]   ;;  %s2393_s5 = inlined_call_operand.vmem [shape: f32[1,32], index: 5, kind: input, shape index: {}]   ;;  %s2394_s6 = inlined_call_operand.<no memory space> [shape: f32[1,1], index: 6, kind: input, shape index: {}]   ;;  %s2395_s7 = inlined_call_operand.hbm [shape: f32[1,256], index: 7, kind: output, shape index: {}]  }
   0x1   :  { %v12_v0 = vstv %s2394_s6 }
   0x2   :  { %13 = vst [vmem:[#allocation2] sm:$0x1] %v12_v0 }
   0x3   :  { %14 = vsyncpa [#allocation4], 0 }
   0x4   :  { %16 = vsyncpa [#allocation4 + $0x1], 0  ;;  %s2049_s26 = smov 0   ;;  %s2051_s27 = smov 0  }
   0x5   :  { %s2053_s28 = smov 0   ;;  %s2055_s29 = smov 0  }
   0x6 LB: > { %s2070_s6 = sadd.s32 4294967295, %s1998_s29   ;;  %s1642_s30 = sadd.s32 4294967294, %s1998_s29   ;;  %s1998_s29 = sphi %s2055_s29, %s2401_s29   ;;  %s1994_s28 = sphi %s2053_s28, %s2400_s28   ;;  %s1990_s27 = sphi %s2051_s27, %s2399_s27   ;;  %s1986_s26 = sphi %s2049_s26, %s2398_s26  }
   0x7   : > { %s2074_s8 = sadd.s32 1, %s1998_s29   ;;  %s181_s9 = sadd.s32 1, %s1994_s28 }
   0x8   : > { %s178_s10 = ssub.s32 %s1998_s29, %s2074_s8  ;;  %p191_p0 = scmp.ne.s32.totalorder %s1994_s28, %s1990_s27 }
   0x9   : > { %p179_p1 = scmp.eq.s32.totalorder %s178_s10, 0  ;;  %p192_p2 = scmp.eq.s32.totalorder %s2070_s6, 1 }
   0xa   : > { %p197_p3 = scmp.ne.s32.totalorder %s1990_s27, %s1986_s26  ;;  %p198_p4 = scmp.eq.s32.totalorder %s1642_s30, 1 }
   0xb   : > { %s2085_s11 = scalar_select %p179_p1, %s1994_s28, %s181_s9  }
   0xc   : > { %p2087_p5 = por %p192_p2, %p191_p0  ;;  %p2091_p6 = por %p198_p4, %p197_p3 }
   0xd   : > { %p1645_p7 = scmp.ge.s32.totalorder %s1998_s29, 1  ;;  %p241_p8 = scmp.lt.s32.totalorder %s1998_s29, 3 }
   0xf   : > { %p242_p9 = pnand %p1645_p7, %p241_p8 }
  0x10   : > { %p271_p10 = scmp.lt.s32.totalorder (!%p242_p9), %s2070_s6, 1  ;;  %s269_s23 = sand.u32 (!%p242_p9), 1, %s1990_s27  }
  0x11   : > { %245 = sbr.rel (%p242_p9) target bundleno = 672 (0x2a0), region = 48  ;;  %s1647_s24 = sshll.u32 (!%p242_p9), %s2070_s6, 4 }
  0x12   : > { %s1575_s15 = scalar_lea.sflag (!%p242_p9), [#allocation4], %s269_s23 }
  0x16   : > { %v298_v1 = vld [vmem:[%s2389_s1 + $0x18] sm:$0xff]  ;;  %v297_v2 = vld [vmem:[%s2389_s1 + $0x10] sm:$0xff]  ;;  %v2000_v3 = vmov 1   ;;  %v2001_v4 = vmov 0   ;;  %v296_v5 = vld [vmem:[%s2389_s1 + $0x8] sm:$0xff]  ;;  %v2002_v6 = vmov 2   ;;  %v319_v34 = vlaneseq }
  0x17   : > { %1922 = vset.pattern.permute.xlu0 %v2000_v3  ;;  %1923 = vset.pattern.permute.xlu1 %v2001_v4  ;;  %v295_v7 = vld [vmem:[%s2389_s1] sm:$0xff]  ;;  %v385_v8 = vld [vmem:[%s2390_s2 + $0x10] sm:$0xff]  ;;  %v422_v9 = vld [vmem:[%s2392_s4 + $0x18] sm:$0xff]  ;;  %vm443_vm0 = vcmask 261120   ;;  %s272_s25 = scalar_select %p271_p10, %s2070_s6, 1  ;;  %vm2004_vm3 = vmmov 0  }
  0x18   : > { %340 = vperm.xlu0 %1922, %v298_v1   ;;  %311 = vperm.xlu1 %1923, %v297_v2   ;;  %v420_v10 = vld [vmem:[%s2392_s4 + $0x8] sm:$0xff]  ;;  %v386_v11 = vld [vmem:[%s2390_s2 + $0x18] sm:$0xff]  ;;  %v1075_v12 = vld [vmem:[#allocation2] sm:$0x1]  ;;  %v2152_v39 = vshrl.u32 %v319_v34, 7  ;;  %s2005_s6 = smov [#allocation3]  }
  0x19   : > { %v415_v13 = vld [vmem:[%s2391_s3] sm:$0xff]  ;;  %v384_v15 = vld [vmem:[%s2390_s2 + $0x8] sm:$0xff]  ;;  %v421_v21 = vld [vmem:[%s2392_s4 + $0x10] sm:$0xff]  ;;  %s1646_s30 = sshll.u32 %s272_s25, 2  ;;  %s270_s25 = scalar_lea.vmem [#allocation3], %s269_s23 }
  0x1a   : > { %v445_v14 = vsel %vm443_vm0, %v415_v13, 0  ;;  %v383_v18 = vld [vmem:[%s2390_s2] sm:$0xff]  ;;  %s274_s14 = scalar_lea.vmem %s2388_s0, %s1646_s30  ;;  %v321_v45 = vsub.s32 1, %v2152_v39  ;;  %v373_v50 = vsub.s32 0, %v2152_v39  ;;  %s1587_s30 = sshll.u32 %s270_s25, 4  ;;  %s1588_s30 = int_to_ptr.vmem [resolvable:$true] %s1587_s30 }
  0x1b   : > { %v2128_v16 = vand.u32 4294901760, %v445_v14  ;;  %v419_v23 = vld [vmem:[%s2392_s4] sm:$0xff]  ;;  %s1938_s16 = scalar_lea.vmem %s1588_s30, 16  ;;  %s1942_s17 = sshll.u32 %s2005_s6, 4  ;;  %s1943_s17 = int_to_ptr.vmem [resolvable:$false] %s1942_s17 }
  0x1c   : > { %1929 = vset.pattern.permute.xlu0 %v2002_v6  ;;  %1924 = vset.pattern.permute.xlu1 %v2000_v3  ;;  %v275_v24 = vld [vmem:[%s274_s14] sm:$0x7]  ;;  %s2353_s14 = scalar_lea.hbm %s2395_s7, %s1647_s24  ;;  %p1939_p11 = scmp.ne.s32.totalorder %s1588_s30, %s1938_s16 }
  0x1d   : > { %336 = vperm.xlu1 %1924, %v297_v2   ;;  %360 = vperm.xlu0 %1929, %v296_v5   ;;  %v2131_v17 = vsub.f32 %v445_v14, %v2128_v16  ;;  %v276_v25 = vmul.f32 -2.0, %v275_v24  ;;  %s1944_s18 = scalar_lea.vmem %s1943_s17, 32  ;;  %p1945_p0 = scmp.lt.s32.totalorder %s1588_s30, %s1943_s17 }
  0x1e   : > { %1750 = vmatprep.mubr.f32.mxu1 %v2128_v16  ;;  %p1940_p12 = pnand %p1939_p11, %p2087_p5  ;;  %p1946_p1 = scmp.lt.s32.totalorder %s1944_s18, %s1938_s16 }
  0x1f   : > { %v527_v19 = vand.u32 4294901760, %v2131_v17  ;;  %v277_v26 = vmul.f32 1.442695, %v276_v25 }
  0x20   : > { %p1941_p13 = pneg %p1940_p12  ;;  %p1947_p2 = por %p1946_p1, %p1945_p0 }
  0x21   : > { %1925 = vset.pattern.permute.xlu1 %v2002_v6  ;;  %1930 = vset.pattern.permute.xlu0 %v2001_v4  ;;  %v528_v20 = vsub.f32 %v2131_v17, %v527_v19  ;;  %1934 = vpow2.f32 %v277_v26 }
  0x22   : > { %368 = vperm.xlu1 %1925, %v298_v1   ;;  %316 = vperm.xlu0 %1930, %v298_v1   ;;  %p1948_p3 = pnand %p1947_p2, %p1941_p13 }
  0x23   : > { %v529_v22 = vand.u32 4294901760, %v528_v20 }
  0x25   : > { %1736 = vmatprep.mubr.f32.mxu0 %v529_v22 }
  0x26   : > { %1926 = vset.pattern.permute.xlu1 %v2000_v3  ;;  %306 = vperm.xlu0 %1930, %v296_v5  }
  0x27   : > { %332 = vperm.xlu1 %1926, %v296_v5   ;;  %v417_v5 = vld [vmem:[%s2391_s3 + $0x10] sm:$0xff] }
  0x28   : > { %v451_v14 = vsel %vm443_vm0, %v417_v5, 0 }
  0x29   : > { %v2177_v22 = vand.u32 4294901760, %v451_v14 }
  0x2a   : > { %301 = vperm.xlu0 %1930, %v295_v7  }
  0x2b   : > { %1927 = vset.pattern.permute.xlu1 %v2002_v6 }
  0x2c   : > { %364 = vperm.xlu1 %1927, %v297_v2   ;;  %v416_v2 = vld [vmem:[%s2391_s3 + $0x8] sm:$0xff] }
  0x2e   : > { %399 = vperm.xlu0 %1930, %v385_v8   ;;  %v1935_v27 = vpop.eup %1934  ;;  %v448_v8 = vsel %vm443_vm0, %v416_v2, 0 }
  0x2f   : > { %v283_v28 = vmul.f32 %v1935_v27, %v1935_v27  ;;  %v280_v40 = vrot.slane %v1935_v27, 1  ;;  %v374_v55 = vrot.slane %v1935_v27, %v373_v50 }
  0x30   : > { %1928 = vset.pattern.permute.xlu1 %v2000_v3 }
  0x31   : > { %328 = vperm.xlu1 %1928, %v295_v7   ;;  %v285_v29 = vrot.slane %v283_v28, 1  ;;  %v282_v46 = vadd.f32 %v1935_v27, %v280_v40 }
  0x32   : > { %440 = vperm.xlu0 %1930, %v422_v9  }
  0x33   : > { %v287_v30 = vadd.f32 %v285_v29, %v283_v28  ;;  %v322_v49 = vrot.slane %v282_v46, %v321_v45 }
  0x35   : > { %1931 = vset.pattern.permute.xlu1 %v2001_v4  ;;  %1936 = vrsqrt.f32 %v287_v30  ;;  %vm290_vm1 = vcmp.eq.f32.partialorder %v287_v30, inf  ;;  %v293_v38 = vand.u32 2147483648, %v287_v30  ;;  %vm292_vm2 = vcmp.eq.f32.partialorder %v287_v30, 0.0 }
  0x36   : > { %430 = vperm.xlu0 %1930, %v420_v10   ;;  %404 = vperm.xlu1 %1931, %v386_v11   ;;  %v418_v10 = vld [vmem:[%s2391_s3 + $0x18] sm:$0xff] }
  0x3a   : > { %1078 = vperm.xlu0 %1930, %v1075_v12   ;;  %1932 = vset.pattern.permute.xlu1 %v2002_v6 }
  0x3b   : > { %356 = vperm.xlu1 %1932, %v295_v7  }
  0x3f   : > { %1933 = vset.pattern.permute.xlu1 %v2001_v4 }
  0x40   : > { %394 = vperm.xlu1 %1933, %v384_v15   ;;  %v2171_v15 = vand.u32 4294901760, %v448_v8 }
  0x42   : > { %v1937_v31 = vpop.eup %1936  ;;  %v2182_v27 = vsub.f32 %v448_v8, %v2171_v15 }
  0x43   : > { %v289_v35 = vmul.f32 %v1937_v31, %v287_v30 }
  0x44   : > { %389 = vperm.xlu1 %1933, %v383_v18  }
  0x45   : > { %v291_v41 = vsel %vm290_vm1, %v287_v30, %v289_v35 }
  0x46   : > { %v294_v42 = vsel %vm292_vm2, %v293_v38, %v291_v41  ;;  %v537_v38 = vand.u32 4294901760, %v2182_v27 }
  0x47   : > { %v346_v47 = vrot.slane %v294_v42, %v321_v45 }
  0x48   : > { %435 = vperm.xlu1 %1933, %v421_v21   ;;  %v454_v21 = vsel %vm443_vm0, %v418_v10, 0 }
  0x49   : > { %v2184_v28 = vand.u32 4294901760, %v454_v21 }
  0x4b   : > { %v2199_v40 = vsub.f32 %v454_v21, %v2184_v28 }
  0x4c   : > { %425 = vperm.xlu1 %1933, %v419_v23  }
  0x93   : > { %v312_v32 = vpop.permute.xlu1 %311  ;;  %v341_v33 = vpop.permute.xlu0 %340 }
  0x94   : > { %v325_v54 = vmul.f32 %v322_v49, %v312_v32  ;;  %v350_v57 = vmul.f32 %v346_v47, %v341_v33  ;;  %v2193_v33 = vsub.f32 %v451_v14, %v2177_v22 }
  0x96   : > { %v547_v45 = vand.u32 4294901760, %v2193_v33 }
  0x98   : > { %v337_v36 = vpop.permute.xlu1 %336  ;;  %v361_v37 = vpop.permute.xlu0 %360 }
  0x99   : > { %v349_v52 = vmul.f32 %v346_v47, %v337_v36  ;;  %v376_v23 = vmul.f32 %v374_v55, %v361_v37 }
  0x9b   : > { %v353_v58 = vadd.f32 %v349_v52, %v325_v54 }
  0x9d   : > { %v369_v43 = vpop.permute.xlu1 %368  ;;  %v317_v44 = vpop.permute.xlu0 %316 }
  0x9e   : > { %v326_v59 = vmul.f32 %v322_v49, %v317_v44  ;;  %v378_v3 = vmul.f32 %v374_v55, %v369_v43 }
  0xa0   : > { %v354_v63 = vadd.f32 %v350_v57, %v326_v59 }
  0xa1   : > { %v307_v48 = vpop.permute.xlu0 %306 }
  0xa2   : > { %v333_v51 = vpop.permute.xlu1 %332  ;;  %v382_v7 = vadd.f32 %v378_v3, %v354_v63  ;;  %v324_v11 = vmul.f32 %v322_v49, %v307_v48 }
  0xa3   : > { %v348_v12 = vmul.f32 %v346_v47, %v333_v51  ;;  %v538_v51 = vsub.f32 %v2182_v27, %v537_v38 }
  0xa5   : > { %v302_v53 = vpop.permute.xlu0 %301  ;;  %v352_v24 = vadd.f32 %v348_v12, %v324_v11 }
  0xa6   : > { %v323_v29 = vmul.f32 %v322_v49, %v302_v53 }
  0xa7   : > { %v365_v56 = vpop.permute.xlu1 %364  ;;  %v380_v35 = vadd.f32 %v376_v23, %v352_v24 }
  0xa8   : > { %v377_v60 = vmul.f32 %v374_v55, %v365_v56  ;;  %v548_v56 = vsub.f32 %v2193_v33, %v547_v45 }
  0xa9   : > { %v400_v62 = vpop.permute.xlu0 %399 }
  0xaa   : > { %v381_v61 = vadd.f32 %v377_v60, %v353_v58  ;;  %v539_v60 = vand.u32 4294901760, %v538_v51  ;;  %v549_v63 = vand.u32 4294901760, %v548_v56 }
  0xac   : > { %v409_v0 = vadd.f32 %v400_v62, %v381_v61  ;;  %v329_v1 = vpop.permute.xlu1 %328 }
  0xad   : > { %v347_v30 = vmul.f32 %v346_v47, %v329_v1 }
  0xae   : > { %v413_v4 = vmax.f32 %v409_v0, 0.0 }
  0xaf   : > { %v351_v41 = vadd.f32 %v347_v30, %v323_v29  ;;  %v1074_v30 = vld [vmem:[%s2393_s5] sm:$0x1] }
  0xb0   : > { %v2164_v6 = vand.u32 4294901760, %v413_v4 }
  0xb1   : > { %v405_v9 = vpop.permute.xlu1 %404 }
  0xb2   : > { %v410_v13 = vadd.f32 %v405_v9, %v382_v7  ;;  %v2174_v18 = vsub.f32 %v413_v4, %v2164_v6  ;;  %v441_v9 = vpop.permute.xlu0 %440 }
  0xb4   : > { %v414_v20 = vmax.f32 %v410_v13, 0.0  ;;  %v2189_v32 = vand.u32 4294901760, %v2174_v18 }
  0xb6   : > { %v2179_v25 = vand.u32 4294901760, %v414_v20  ;;  %v357_v26 = vpop.permute.xlu1 %356  ;;  %v600_v44 = vsub.f32 %v2174_v18, %v2189_v32 }
  0xb7   : > { %v375_v34 = vmul.f32 %v374_v55, %v357_v26  ;;  %v557_v55 = vand.u32 4294901760, %v2199_v40 }
  0xb8   : > { %v591_v31 = vsub.f32 %v414_v20, %v2179_v25  ;;  %1728 = vmatprep.subr.mxu0 %v2179_v25  ;;  %v601_v54 = vand.u32 4294901760, %v600_v44 }
  0xb9   : > { %1729 = vmatpush3.msra.mxu0 %v2179_v25  ;;  %v379_v47 = vadd.f32 %v375_v34, %v351_v41  ;;  %v558_v62 = vsub.f32 %v2199_v40, %v557_v55  ;;  %v1086_v41 = vsel %vm443_vm0, %v1074_v30, 0 }
  0xba   : > { %1730 = vmatprep.subr.mxu0 %v2164_v6  ;;  %v592_v36 = vand.u32 4294901760, %v591_v31 }
  0xbb   : > { %v395_v37 = vpop.permute.xlu1 %394  ;;  %1731 = vmatpush3.msra.mxu0 %v2164_v6  ;;  %v559_v3 = vand.u32 4294901760, %v558_v62 }
  0xbc   : > { %v408_v42 = vadd.f32 %v395_v37, %v380_v35  ;;  %v593_v43 = vsub.f32 %v591_v31, %v592_v36 }
  0xbe   : > { %v412_v46 = vmax.f32 %v408_v42, 0.0  ;;  %v594_v48 = vand.u32 4294901760, %v593_v43 }
  0xbf   : > { %v390_v49 = vpop.permute.xlu1 %389 }
  0xc0   : > { %v2207_v52 = vand.u32 4294901760, %v412_v46  ;;  %v407_v53 = vadd.f32 %v390_v49, %v379_v47  ;;  %1742 = vmatprep.subr.mxu1 %v594_v48  ;;  %v2277_v47 = vand.u32 4294901760, %v1086_v41 }
  0xc1   : > { %1743 = vmatpush3.msra.mxu1 %v594_v48 }
  0xc2   : > { %v605_v57 = vsub.f32 %v412_v46, %v2207_v52  ;;  %v411_v58 = vmax.f32 %v407_v53, 0.0  ;;  %1732 = vmatprep.subr.mxu0 %v2207_v52  ;;  %1744 = vmatprep.subr.mxu1 %v601_v54 }
  0xc3   : > { %1733 = vmatpush3.msra.mxu0 %v2207_v52  ;;  %1745 = vmatpush3.msra.mxu1 %v601_v54  ;;  %v436_v12 = vpop.permute.xlu1 %435 }
  0xc4   : > { %v2216_v59 = vand.u32 4294901760, %v411_v58  ;;  %v606_v61 = vand.u32 4294901760, %v605_v57 }
  0xc6   : > { %v612_v0 = vsub.f32 %v411_v58, %v2216_v59  ;;  %1734 = vmatprep.subr.mxu0 %v2216_v59  ;;  %v607_v1 = vsub.f32 %v605_v57, %v606_v61  ;;  %v2280_v58 = vsub.f32 %v1086_v41, %v2277_v47 }
  0xc7   : > { %1735 = vmatpush3.msra.mxu0 %v2216_v59 }
  0xc8   : > { %1737 = vmatmul.mubr.f32.vlgmr.msra.gmra.mxu0 %v539_v60  ;;  %1756 = vmatprep.subr.mxu0 %v591_v31  ;;  %v608_v2 = vand.u32 4294901760, %v607_v1  ;;  %v613_v4 = vand.u32 4294901760, %v612_v0 }
  0xc9   : > { %1757 = vmatpush3.msra.mxu0 %v591_v31  ;;  %1739 = vmatprep.mubr.f32.mxu0 %v549_v63 }
  0xca   : > { %1746 = vmatprep.subr.mxu1 %v608_v2  ;;  %1758 = vmatprep.subr.mxu0 %v2174_v18  ;;  %v614_v5 = vsub.f32 %v612_v0, %v613_v4 }
  0xcb   : > { %1747 = vmatpush3.msra.mxu1 %v608_v2  ;;  %1759 = vmatpush3.msra.mxu0 %v2174_v18  ;;  %v431_v18 = vpop.permute.xlu0 %430 }
  0xcc   : > { %1740 = vmatmul.mubr.f32.gmra.mxu0 %v559_v3  ;;  %1760 = vmatprep.subr.mxu0 %v605_v57  ;;  %v615_v7 = vand.u32 4294901760, %v614_v5 }
  0xcd   : > { %1761 = vmatpush3.msra.mxu0 %v605_v57  ;;  %1764 = vmatprep.mubr.f32.mxu0 %v2131_v17  ;;  %v2003_v17 = vmov 0.0  }
  0xce   : > { %1748 = vmatprep.subr.mxu1 %v615_v7  ;;  %1762 = vmatprep.subr.mxu0 %v612_v0 }
  0xcf   : > { %1749 = vmatpush3.msra.mxu1 %v615_v7  ;;  %1763 = vmatpush3.msra.mxu0 %v612_v0 }
  0xd0   : > { %1751 = vmatmul.mubr.f32.vlgmr.msra.gmra.mxu1 %v2171_v15  ;;  %1770 = vmatprep.subr.mxu1 %v2179_v25 }
  0xd1   : > { %1784 = vmatprep.subr.mxu0 %v592_v36  ;;  %1765 = vmatmul.mubr.f32.vlgmr.msra.gmra.mxu0 %v2182_v27 }
  0xd2   : > { %1771 = vmatpush3.msra.mxu1 %v2179_v25  ;;  %1785 = vmatpush3.msra.mxu0 %v592_v36 }
  0xd3   : > { %1772 = vmatprep.subr.mxu1 %v2164_v6  ;;  %1786 = vmatprep.subr.mxu0 %v2189_v32 }
  0xd4   : > { %1753 = vmatprep.mubr.f32.mxu1 %v2177_v22  ;;  %1773 = vmatpush3.msra.mxu1 %v2164_v6 }
  0xd5   : > { %1787 = vmatpush3.msra.mxu0 %v2189_v32  ;;  %1754 = vmatmul.mubr.f32.gmra.mxu1 %v2184_v28 }
  0xd6   : > { %1774 = vmatprep.subr.mxu1 %v2207_v52  ;;  %1788 = vmatprep.subr.mxu0 %v606_v61 }
  0xd7   : > { %1767 = vmatprep.mubr.f32.mxu0 %v2193_v33  ;;  %1775 = vmatpush3.msra.mxu1 %v2207_v52 }
  0xd8   : > { %1789 = vmatpush3.msra.mxu0 %v606_v61  ;;  %1776 = vmatprep.subr.mxu1 %v2216_v59 }
  0xd9   : > { %1768 = vmatmul.mubr.f32.gmra.mxu0 %v2199_v40  ;;  %1790 = vmatprep.subr.mxu0 %v613_v4 }
  0xda   : > { %1777 = vmatpush3.msra.mxu1 %v2216_v59  ;;  %1778 = vmatprep.mubr.f32.mxu1 %v527_v19 }
  0xdb   : > { %1791 = vmatpush3.msra.mxu0 %v613_v4  ;;  %1779 = vmatmul.mubr.f32.vlgmr.msra.gmra.mxu1 %v537_v38  ;;  %v1159_v4 = vand.u32 4294901760, %v2280_v58 }
  0xdc   : > { %1798 = vmatprep.subr.mxu1 %v2179_v25  ;;  %1792 = vmatprep.mubr.f32.mxu0 %v2128_v16 }
  0xdd   : > { %1799 = vmatpush3.msra.mxu1 %v2179_v25  ;;  %1793 = vmatmul.mubr.f32.vlgmr.msra.gmra.mxu0 %v2171_v15 }
  0xde   : > { %1800 = vmatprep.subr.mxu1 %v2164_v6  ;;  %1781 = vmatprep.mubr.f32.mxu1 %v547_v45 }
  0xdf   : > { %1801 = vmatpush3.msra.mxu1 %v2164_v6  ;;  %1795 = vmatprep.mubr.f32.mxu0 %v2177_v22 }
  0xe0   : > { %1782 = vmatmul.mubr.f32.gmra.mxu1 %v557_v55  ;;  %1802 = vmatprep.subr.mxu1 %v2207_v52 }
  0xe1   : > { %1803 = vmatpush3.msra.mxu1 %v2207_v52  ;;  %1796 = vmatmul.mubr.f32.gmra.mxu0 %v2184_v28 }
  0xe2   : > { %1804 = vmatprep.subr.mxu1 %v2216_v59  ;;  %1806 = vmatprep.mubr.f32.mxu1 %v2128_v16 }
  0xe3   : > { %1805 = vmatpush3.msra.mxu1 %v2216_v59  ;;  %1812 = vmatprep.subr.mxu0 %v2003_v17 }
  0xe4   : > { %1807 = vmatmul.mubr.f32.vlgmr.msra.gmra.mxu1 %v2171_v15  ;;  %1823 = vmatprep.subr.mxu1 %v2003_v17 }
  0xe5   : > { %1809 = vmatprep.mubr.f32.mxu1 %v2177_v22  ;;  %1820 = vmatprep.mubr.msk.f32.mxu0 %vm2004_vm3, %v2003_v17  ;;  %v426_v22 = vpop.permute.xlu1 %425 }
  0xe8   : > { %1810 = vmatmul.mubr.f32.gmra.mxu1 %v2184_v28 }
  0xe9   : > { %1831 = vmatprep.mubr.msk.f32.mxu1 %vm2004_vm3, %v2003_v17 }
 0x188   : > { %v1738_v16 = vpop.f32.mrf.mxu0 }
 0x189   : > { %v542_v20 = vadd.f32 %v1738_v16, %v431_v18 }
 0x18a   : > { %v531_v19 = vpop.f32.mrf.mxu0 }
 0x18b   : > { %v532_v23 = vadd.f32 %v531_v19, %v426_v22 }
 0x18c   : > { %v1741_v6 = vpop.f32.mrf.mxu0 }
 0x18d   : > { %v562_v26 = vadd.f32 %v1741_v6, %v441_v9  ;;  %v1160_v9 = vsub.f32 %v2280_v58, %v1159_v4 }
 0x18e   : > { %v551_v8 = vpop.f32.mrf.mxu0 }
 0x18f   : > { %v552_v31 = vadd.f32 %v551_v8, %v436_v12  ;;  %v1161_v18 = vand.u32 4294901760, %v1160_v9 }
 0x190   : > { %v1752_v10 = vpop.f32.mrf.mxu1 }
 0x191   : > { %v1766_v11 = vpop.f32.mrf.mxu0  ;;  %v659_v24 = vadd.f32 %v1752_v10, %v542_v20 }
 0x192   : > { %v652_v13 = vpop.f32.mrf.mxu1 }
 0x193   : > { %v750_v15 = vpop.f32.mrf.mxu0  ;;  %v653_v27 = vadd.f32 %v652_v13, %v532_v23  ;;  %v758_v32 = vadd.f32 %v1766_v11, %v659_v24 }
 0x195   : > { %v1755_v14 = vpop.f32.mrf.mxu1  ;;  %v751_v36 = vadd.f32 %v750_v15, %v653_v27 }
 0x196   : > { %v671_v33 = vadd.f32 %v1755_v14, %v562_v26 }
 0x197   : > { %v664_v21 = vpop.f32.mrf.mxu1 }
 0x198   : > { %v665_v37 = vadd.f32 %v664_v21, %v552_v31 }
 0x199   : > { %v1769_v25 = vpop.f32.mrf.mxu0 }
 0x19a   : > { %v772_v43 = vadd.f32 %v1769_v25, %v671_v33 }
 0x19b   : > { %v764_v28 = vpop.f32.mrf.mxu0  ;;  %v1780_v29 = vpop.f32.mrf.mxu1 }
 0x19c   : > { %v857_v38 = vadd.f32 %v1780_v29, %v758_v32  ;;  %v765_v48 = vadd.f32 %v764_v28, %v665_v37  ;;  %v1079_v32 = vpop.permute.xlu0 %1078 }
 0x19d   : > { %v848_v34 = vpop.f32.mrf.mxu1  ;;  %v1794_v35 = vpop.f32.mrf.mxu0 }
 0x19e   : > { %v849_v44 = vadd.f32 %v848_v34, %v751_v36  ;;  %v962_v49 = vadd.f32 %v1794_v35, %v857_v38  ;;  %v1084_v36 = vrot.slane %v1079_v32, %v373_v50 }
 0x19f   : > { %v955_v40 = vpop.f32.mrf.mxu0 }
 0x1a0   : > { %v1783_v42 = vpop.f32.mrf.mxu1  ;;  %v956_v53 = vadd.f32 %v955_v40, %v849_v44 }
 0x1a1   : > { %v1797_v46 = vpop.f32.mrf.mxu0  ;;  %v873_v51 = vadd.f32 %v1783_v42, %v772_v43 }
 0x1a2   : > { %v864_v45 = vpop.f32.mrf.mxu1 }
 0x1a3   : > { %v865_v54 = vadd.f32 %v864_v45, %v765_v48  ;;  %v967_v56 = vpop.f32.mrf.mxu0  ;;  %v974_v59 = vadd.f32 %v1797_v46, %v873_v51 }
 0x1a4   : > { %v1808_v52 = vpop.f32.mrf.mxu1 }
 0x1a5   : > { %v1055_v55 = vadd.f32 %v1808_v52, %v962_v49  ;;  %v968_v63 = vadd.f32 %v967_v56, %v865_v54 }
 0x1a6   : > { %v1048_v57 = vpop.f32.mrf.mxu1 }
 0x1a7   : > { %v1071_v60 = vmax.f32 %v1055_v55, 0.0  ;;  %v1049_v61 = vadd.f32 %v1048_v57, %v956_v53 }
 0x1a8   : > { %v1811_v62 = vpop.f32.mrf.mxu1 }
 0x1a9   : > { %v2282_v0 = vand.u32 4294901760, %v1071_v60  ;;  %v1070_v1 = vmax.f32 %v1049_v61, 0.0  ;;  %v1067_v2 = vadd.f32 %v1811_v62, %v974_v59 }
 0x1aa   : > { %v1060_v3 = vpop.f32.mrf.mxu1 }
 0x1ab   : > { %v2285_v5 = vand.u32 4294901760, %v1070_v1  ;;  %v1073_v7 = vmax.f32 %v1067_v2, 0.0  ;;  %v1061_v16 = vadd.f32 %v1060_v3, %v968_v63  ;;  %v1207_v19 = vsub.f32 %v1071_v60, %v2282_v0 }
 0x1ad   : > { %v2288_v6 = vand.u32 4294901760, %v1073_v7  ;;  %v1072_v8 = vmax.f32 %v1061_v16, 0.0  ;;  %v1214_v10 = vsub.f32 %v1070_v1, %v2285_v5  ;;  %v1208_v13 = vand.u32 4294901760, %v1207_v19 }
 0x1af   : > { %v1193_v11 = vsub.f32 %v1073_v7, %v2288_v6  ;;  %v2295_v12 = vand.u32 4294901760, %v1072_v8  ;;  %1813 = vmatpush3.msra.mxu0 %v2288_v6  ;;  %v1215_v20 = vand.u32 4294901760, %v1214_v10  ;;  %v1209_v23 = vsub.f32 %v1207_v19, %v1208_v13 }
 0x1b0   : > { %1814 = vmatprep.subr.mxu0 %v2003_v17 }
 0x1b1   : > { %v1194_v14 = vand.u32 4294901760, %v1193_v11  ;;  %v1200_v15 = vsub.f32 %v1072_v8, %v2295_v12  ;;  %1815 = vmatpush3.msra.mxu0 %v2295_v12  ;;  %v1216_v26 = vsub.f32 %v1214_v10, %v1215_v20  ;;  %v1210_v28 = vand.u32 4294901760, %v1209_v23 }
 0x1b2   : > { %1816 = vmatprep.subr.mxu0 %v2003_v17 }
 0x1b3   : > { %v1195_v21 = vsub.f32 %v1193_v11, %v1194_v14  ;;  %v1201_v22 = vand.u32 4294901760, %v1200_v15  ;;  %1817 = vmatpush3.msra.mxu0 %v2282_v0  ;;  %v1217_v29 = vand.u32 4294901760, %v1216_v26 }
 0x1b4   : > { %1818 = vmatprep.subr.mxu0 %v2003_v17 }
 0x1b5   : > { %v1202_v24 = vsub.f32 %v1200_v15, %v1201_v22  ;;  %1819 = vmatpush3.msra.mxu0 %v2285_v5  ;;  %v1196_v25 = vand.u32 4294901760, %v1195_v21 }
 0x1b6   : > { %1821 = vmatmul.mubr.f32.vlgmr.msra.gmra.mxu0 %v1161_v18  ;;  %1834 = vmatprep.subr.mxu0 %v2003_v17 }
 0x1b7   : > { %1824 = vmatpush3.msra.mxu1 %v1196_v25  ;;  %1835 = vmatpush3.msra.mxu0 %v1193_v11  ;;  %v1203_v27 = vand.u32 4294901760, %v1202_v24 }
 0x1b8   : > { %1825 = vmatprep.subr.mxu1 %v2003_v17  ;;  %1836 = vmatprep.subr.mxu0 %v2003_v17 }
 0x1b9   : > { %1826 = vmatpush3.msra.mxu1 %v1203_v27  ;;  %1837 = vmatpush3.msra.mxu0 %v1200_v15 }
 0x1ba   : > { %1827 = vmatprep.subr.mxu1 %v2003_v17  ;;  %1838 = vmatprep.subr.mxu0 %v2003_v17 }
 0x1bb   : > { %1828 = vmatpush3.msra.mxu1 %v1210_v28  ;;  %1839 = vmatpush3.msra.mxu0 %v1207_v19 }
 0x1bc   : > { %1829 = vmatprep.subr.mxu1 %v2003_v17  ;;  %1840 = vmatprep.subr.mxu0 %v2003_v17 }
 0x1bd   : > { %1830 = vmatpush3.msra.mxu1 %v1217_v29  ;;  %1841 = vmatpush3.msra.mxu0 %v1214_v10 }
 0x1be   : > { %1832 = vmatmul.mubr.f32.vlgmr.msra.gmra.mxu1 %v2277_v47  ;;  %1842 = vmatprep.mubr.msk.f32.mxu0 %vm2004_vm3, %v2003_v17 }
 0x1bf   : > { %1845 = vmatprep.subr.mxu1 %v2003_v17  ;;  %1856 = vmatprep.subr.mxu0 %v2003_v17 }
 0x1c0   : > { %1843 = vmatmul.mubr.f32.vlgmr.msra.gmra.mxu0 %v2280_v58  ;;  %1846 = vmatpush3.msra.mxu1 %v2288_v6 }
 0x1c1   : > { %1857 = vmatpush3.msra.mxu0 %v1194_v14  ;;  %1847 = vmatprep.subr.mxu1 %v2003_v17 }
 0x1c2   : > { %1858 = vmatprep.subr.mxu0 %v2003_v17  ;;  %1848 = vmatpush3.msra.mxu1 %v2295_v12 }
 0x1c3   : > { %1859 = vmatpush3.msra.mxu0 %v1201_v22  ;;  %1849 = vmatprep.subr.mxu1 %v2003_v17 }
 0x1c4   : > { %1860 = vmatprep.subr.mxu0 %v2003_v17  ;;  %1850 = vmatpush3.msra.mxu1 %v2282_v0 }
 0x1c5   : > { %1861 = vmatpush3.msra.mxu0 %v1208_v13  ;;  %1851 = vmatprep.subr.mxu1 %v2003_v17 }
 0x1c6   : > { %1862 = vmatprep.subr.mxu0 %v2003_v17  ;;  %1852 = vmatpush3.msra.mxu1 %v2285_v5 }
 0x1c7   : > { %1853 = vmatprep.mubr.msk.f32.mxu1 %vm2004_vm3, %v2003_v17  ;;  %1863 = vmatpush3.msra.mxu0 %v1215_v20 }
 0x1c8   : > { %1854 = vmatmul.mubr.f32.vlgmr.msra.gmra.mxu1 %v1159_v4  ;;  %1867 = vmatprep.subr.mxu1 %v2003_v17 }
 0x1c9   : > { %1864 = vmatprep.mubr.msk.f32.mxu0 %vm2004_vm3, %v2003_v17  ;;  %1868 = vmatpush3.msra.mxu1 %v2288_v6 }
 0x1ca   : > { %1865 = vmatmul.mubr.f32.vlgmr.msra.gmra.mxu0 %v2277_v47  ;;  %1869 = vmatprep.subr.mxu1 %v2003_v17 }
 0x1cb   : > { %1870 = vmatpush3.msra.mxu1 %v2295_v12  ;;  %1875 = vmatprep.mubr.msk.f32.mxu1 %vm2004_vm3, %v2003_v17 }
 0x1cc   : > { %1871 = vmatprep.subr.mxu1 %v2003_v17 }
 0x1cd   : > { %1872 = vmatpush3.msra.mxu1 %v2282_v0 }
 0x1ce   : > { %1873 = vmatprep.subr.mxu1 %v2003_v17 }
 0x1cf   : > { %1874 = vmatpush3.msra.mxu1 %v2285_v5 }
 0x1d0   : > { %1876 = vmatmul.mubr.f32.vlgmr.msra.gmra.mxu1 %v2277_v47 }
 0x276   : > { %v1163_v30 = vpop.f32.mrf.mxu0 }
 0x277   : > { %v1164_v38 = vadd.f32 %v1163_v30, %v1084_v36 }
 0x278   : > { %v1822_v31 = vpop.f32.mrf.mxu0 }
 0x27e   : > { %v1254_v33 = vpop.f32.mrf.mxu1 }
 0x27f   : > { %v1255_v40 = vadd.f32 %v1254_v33, %v1164_v38 }
 0x280   : > { %v1833_v34 = vpop.f32.mrf.mxu1  ;;  %v1334_v35 = vpop.f32.mrf.mxu0 }
 0x281   : > { %v1335_v17 = vadd.f32 %v1334_v35, %v1255_v40 }
 0x282   : > { %v1844_v37 = vpop.f32.mrf.mxu0 }
 0x288   : > { %v1411_v41 = vpop.f32.mrf.mxu1 }
 0x289   : > { %v1412_v44 = vadd.f32 %v1411_v41, %v1335_v17 }
 0x28a   : > { %v1855_v42 = vpop.f32.mrf.mxu1  ;;  %v1494_v43 = vpop.f32.mrf.mxu0 }
 0x28b   : > { %v1495_v46 = vadd.f32 %v1494_v43, %v1412_v44 }
 0x28c   : > { %v1866_v45 = vpop.f32.mrf.mxu0 }
 0x290   : > { %v1569_v47 = vpop.f32.mrf.mxu1 }
 0x291   : > { %v1570_v48 = vadd.f32 %v1569_v47, %v1495_v46 }
 0x292   : > { %v1877_v39 = vpop.f32.mrf.mxu1 }
 0x293   : > { %1573 = vst [vmem:[%s270_s25] sm:$0x1] %v1570_v48 }
 0x294   : > { %1951 = shalt.err (!%p1948_p3)
}
 0x295   : > { %s1952_s19 = scalar_lea.hbm %s2353_s14, 16  ;;  %s1956_s22 = scalar_lea.hbm %s2395_s7, 32 }
 0x296   : > { %p1953_p4 = scmp.ne.s32.totalorder %s2353_s14, %s1952_s19  ;;  %p1957_p9 = scmp.lt.s32.totalorder %s2353_s14, %s2395_s7 }
 0x297   : > { %p1958_p10 = scmp.lt.s32.totalorder %s1956_s22, %s1952_s19 }
 0x298   : > { %p1954_p7 = pnand %p1953_p4, %p2087_p5 }
 0x299   : > { %p1959_p11 = por %p1958_p10, %p1957_p9 }
 0x29a   : > { %p1955_p8 = pneg %p1954_p7 }
 0x29c   : > { %p1960_p12 = pnand %p1959_p11, %p1955_p8 }
 0x29e   : > { %1963 = shalt.err (!%p1960_p12)
}
 0x29f   : > { %1878 = dma.vmem_to_hbm [thread:$0]  (%p2087_p5), %s1588_s30, 16, %s2353_s14, %s1575_s15  }
 0x2a0 PF: > { %p1884_p13 = scmp.ge.s32.totalorder %s1998_s29, 2  ;;  %s1599_s25 = sand.u32 1, %s1986_s26  }
 0x2a1   : > { %s1600_s9 = scalar_lea.sflag [#allocation4], %s1599_s25 }
 0x2a2   : > { %p1881_p0 = pnand %p1884_p13, %p2091_p6 }
 0x2a4   : > { %p1882_p1 = pneg %p1881_p0 }
 0x2a6   : > { %1981 = dma.done.wait (%p1882_p1), %s1600_s9, 16  }
 0x2a7   : > { %1983 = vsyncadd (%p1882_p1), %s1600_s9, 4294967280  ;;  %p19_p2 = scmp.ge.s32.totalorder %s2074_s8, 4   ;;  %s2398_s26 = smov %s1990_s27 }
 0x2a8   : > { %s2399_s27 = smov %s1994_s28  ;;  %s2400_s28 = smov %s2085_s11 }
 0x2a9   : > { %s2401_s29 = smov %s2074_s8  ;;  %21 = sbr.rel (!%p19_p2) target bundleno = 6 (0x6), region = 83 }
 0x2ae   :  { %1604 = vsyncpa [#allocation4], 1 }
 0x2af   :  { %1606 = vsyncpa [#allocation4 + $0x1], 1 }

</bundles_post_ra>
